<compile_context>
chip_gen: v6e
topology: v6e:2x2x1
jax: 0.10.0
libtpu: 0.0.40
codegen_flags: <defaults>
</compile_context>

<pallas_src>
import math

import jax
import jax.numpy as jnp
from jax.experimental import pallas as pl
from jax.experimental.pallas import tpu as pltpu

_LOG_2PI = math.log(2.0 * math.pi)


def _round_up(x, m):
    return ((x + m - 1) // m) * m


# ---------------------------------------------------------------------------
# Kernel (feature-major / transposed layout).
#   xT   : (S, TB)        state^T tile
#   aT   : (A, TB)        action^T tile
#   w1t  : (HW, S)        [actor_L1 ; value_L1]^T                -> tanh
#   w2t  : (HW, HW)       block-diag(actor_L2, value_L2)^T       -> tanh
#   w3t  : (HEAD, HW)     rows [0:A)=mean^T, [A:2A)=std^T, [2A]=value^T
#   b    : (BR, 3)        bias columns for the three fused layers (f32)
#   out  : (3, TB)        row0=logp, row1=value, row2=entropy
# ---------------------------------------------------------------------------
def _ppo_eval_kernel(xT_ref, aT_ref, w1_ref, w2_ref, w3_ref, b_ref, out_ref):
    f32 = jnp.float32
    wdt = w1_ref.dtype                     # matmul operand dtype (f32 or bf16)
    HW = w1_ref.shape[0]
    HEAD = w3_ref.shape[0]
    A = aT_ref.shape[0]

    xT = xT_ref[...].astype(wdt)           # (S, TB)
    aT = aT_ref[...].astype(f32)           # (A, TB)
    b = b_ref[...]                          # (BR, 3), always f32
    b1 = b[:HW, 0:1]                        # (HW, 1)  broadcast over lanes
    b2 = b[:HW, 1:2]
    b3 = b[:HEAD, 2:3]                      # (HEAD, 1)

    # Fused trunk: actor + value hidden layers in one wide matmul each.
    h1 = jnp.tanh(jnp.dot(w1_ref[...], xT, preferred_element_type=f32) + b1)
    h2 = jnp.tanh(jnp.dot(w2_ref[...], h1.astype(wdt),
                          preferred_element_type=f32) + b2)
    # Fused heads: mean / std(pre-exp) / value in one matmul.
    head = jnp.dot(w3_ref[...], h2.astype(wdt),
                   preferred_element_type=f32) + b3          # (HEAD, TB)

    mean = jnp.tanh(head[0:A, :])                             # (A, TB)
    log_std = head[A:2 * A, :]                                # std=exp(raw) -> log_std=raw
    value = head[2 * A:2 * A + 1, :]                          # (1, TB)

    diff = aT - mean
    inv_var = jnp.exp(-2.0 * log_std)                         # 1 / std^2
    per_dim = -0.5 * diff * diff * inv_var - log_std - 0.5 * _LOG_2PI
    logp = jnp.sum(per_dim, axis=0, keepdims=True)            # (1, TB)
    ent = jnp.sum(log_std, axis=0, keepdims=True) + A * (0.5 + 0.5 * _LOG_2PI)

    out_ref[0:1, :] = logp
    out_ref[1:2, :] = value
    out_ref[2:3, :] = ent


# ---------------------------------------------------------------------------
# Wrapper-side (one-time) parameter packing.  Weights are stored transposed
# (feature-major).  dtype=bfloat16 gives the full-rate MXU path; use float32
# for bit-faithful parity with the PyTorch reference.
# ---------------------------------------------------------------------------
def pack_params(params, dtype=jnp.bfloat16):
    (w_a1, b_a1), (w_a2, b_a2) = params["actor"]
    w_m, b_m = params["mean"]
    w_s, b_s = params["std"]
    (w_v1, b_v1), (w_v2, b_v2), (w_v3, b_v3) = params["value"]

    S, H = w_a1.shape
    A = w_m.shape[1]
    HW = 2 * H
    HEAD = _round_up(2 * A + 1, 8)
    BR = max(HW, HEAD)
    f32 = jnp.float32

    w1t = jnp.concatenate([w_a1.T, w_v1.T], axis=0).astype(f32)        # (HW, S)

    w2t = jnp.zeros((HW, HW), f32)
    w2t = w2t.at[:H, :H].set(w_a2.T).at[H:, H:].set(w_v2.T)            # block-diag^T

    w3t = jnp.zeros((HEAD, HW), f32)
    w3t = w3t.at[0:A, :H].set(w_m.T).at[A:2 * A, :H].set(w_s.T)
    w3t = w3t.at[2 * A, H:].set(w_v3[:, 0])

    b = jnp.zeros((BR, 3), f32)
    b = b.at[:HW, 0].set(jnp.concatenate([b_a1, b_v1]))
    b = b.at[:HW, 1].set(jnp.concatenate([b_a2, b_v2]))
    b = b.at[0:A, 2].set(b_m).at[A:2 * A, 2].set(b_s).at[2 * A, 2].set(b_v3[0])

    return w1t.astype(dtype), w2t.astype(dtype), w3t.astype(dtype), b


# ---------------------------------------------------------------------------
# Batch tiling: TB is a multiple of 128 (lane-dense output rows), defaults to
# a fat tile (block_b=4096) so the fixed per-grid-step cost is amortized, and
# is capped at ceil(B/2) once B >= 256 so the parallel grid axis always has
# >= 2 blocks (keeps both v7x TensorCores busy; harmless on v5e/v6e).
# ---------------------------------------------------------------------------
def _choose_tiling(B, block_b):
    target = min(max(block_b, 128), _round_up(B, 128))
    if B >= 256:
        target = min(target, _round_up(-(-B // 2), 128))
    TB = max(128, (target // 128) * 128)
    Bp = _round_up(B, TB)
    return TB, Bp, Bp // TB


# ---------------------------------------------------------------------------
# Pallas-backed evaluate()
# ---------------------------------------------------------------------------
def actor_critic_continuous_evaluate(state, action, packed, *, block_b=4096):
    """Equivalent of ActorCriticContinuous.evaluate(state, action).

    state:  (B, state_dim) float32
    action: (B, action_dim) float32
    packed: output of pack_params(params)
    Returns (action_logprobs (B,), state_value (B,), dist_entropy (B,)).
    """
    w1t, w2t, w3t, b = packed
    B, S = state.shape
    A = action.shape[1]
    HW = w1t.shape[0]
    HEAD = w3t.shape[0]
    BR = b.shape[0]

    TB, Bp, nb = _choose_tiling(B, block_b)
    if Bp != B:
        state = jnp.pad(state, ((0, Bp - B), (0, 0)))
        action = jnp.pad(action, ((0, Bp - B), (0, 0)))
    # Layout plumbing (not compute hoisting): feature-major inputs make the
    # kernel's output rows lane-dense and its head slices sublane slices.
    state_T = jnp.transpose(state)          # (S, Bp)
    action_T = jnp.transpose(action)        # (A, Bp)

    grid_spec = pltpu.PrefetchScalarGridSpec(
        num_scalar_prefetch=0,
        grid=(nb,),
        in_specs=[
            pl.BlockSpec((S, TB), lambda i: (0, i)),      # state^T (streamed)
            pl.BlockSpec((A, TB), lambda i: (0, i)),      # action^T (streamed)
            pl.BlockSpec((HW, S), lambda i: (0, 0)),      # W1^T (resident)
            pl.BlockSpec((HW, HW), lambda i: (0, 0)),     # W2^T (resident)
            pl.BlockSpec((HEAD, HW), lambda i: (0, 0)),   # W3^T (resident)
            pl.BlockSpec((BR, 3), lambda i: (0, 0)),      # biases (resident)
        ],
        out_specs=pl.BlockSpec((3, TB), lambda i: (0, i)),
    )

    w_itemsize = jnp.dtype(w1t.dtype).itemsize
    flops = 2 * Bp * HW * (S + HW + HEAD) + 12 * Bp * A
    transcendentals = Bp * (2 * HW + 2 * A)
    bytes_accessed = (4 * Bp * (S + A + 3)
                      + w_itemsize * (HW * S + HW * HW + HEAD * HW)
                      + 4 * BR * 3)

    out = pl.pallas_call(
        _ppo_eval_kernel,
        out_shape=jax.ShapeDtypeStruct((3, Bp), jnp.float32),
        grid_spec=grid_spec,
        compiler_params=pltpu.CompilerParams(dimension_semantics=("parallel",)),
        cost_estimate=pl.CostEstimate(flops=flops,
                                      transcendentals=transcendentals,
                                      bytes_accessed=bytes_accessed),
    )(state_T, action_T, w1t, w2t, w3t, b)

    return out[0, :B], out[1, :B], out[2, :B]


# ---------------------------------------------------------------------------
# Deterministic parameter construction (PyTorch nn.Linear default init style).
# Weights are stored as (in_features, out_features) so x @ W matches nn.Linear.
# ---------------------------------------------------------------------------
def _init_linear(key, fan_in, fan_out):
    kw, kb = jax.random.split(key)
    bound = 1.0 / jnp.sqrt(jnp.float32(fan_in))
    w = jax.random.uniform(kw, (fan_in, fan_out), jnp.float32, -bound, bound)
    b = jax.random.uniform(kb, (fan_out,), jnp.float32, -bound, bound)
    return w, b


def make_params(key, state_dim, action_dim, n_latent_var):
    keys = jax.random.split(key, 7)
    actor = [_init_linear(keys[0], state_dim, n_latent_var),
             _init_linear(keys[1], n_latent_var, n_latent_var)]
    mean = _init_linear(keys[2], n_latent_var, action_dim)
    std = _init_linear(keys[3], n_latent_var, action_dim)
    value = [_init_linear(keys[4], state_dim, n_latent_var),
             _init_linear(keys[5], n_latent_var, n_latent_var),
             _init_linear(keys[6], n_latent_var, 1)]
    return {"actor": actor, "mean": mean, "std": std, "value": value}


# ---------------------------------------------------------------------------
# Pure-JAX reference (mirrors the PyTorch evaluate() exactly).
# ---------------------------------------------------------------------------
def _reference(state, action, params):
    (w_a1, b_a1), (w_a2, b_a2) = params["actor"]
    w_m, b_m = params["mean"]
    w_s, b_s = params["std"]

    h = jnp.tanh(state @ w_a1 + b_a1)
    h = jnp.tanh(h @ w_a2 + b_a2)
    mean = jnp.tanh(h @ w_m + b_m)
    std = jnp.exp(h @ w_s + b_s)
    var = std * std

    logp = jnp.sum(-((action - mean) ** 2) / (2.0 * var)
                   - jnp.log(std) - 0.5 * _LOG_2PI, axis=-1)
    ent = jnp.sum(0.5 + 0.5 * _LOG_2PI + jnp.log(std), axis=-1)

    v = state
    for i, (w, bb) in enumerate(params["value"]):
        v = v @ w + bb
        if i < len(params["value"]) - 1:
            v = jnp.tanh(v)
    return logp, v[:, 0], ent


if __name__ == "__main__":
    B, state_dim, action_dim, n_latent_var = 8, 16, 4, 32

    key = jax.random.PRNGKey(0)
    k_params, k_state, k_action = jax.random.split(key, 3)

    params = make_params(k_params, state_dim, action_dim, n_latent_var)
    state = jax.random.normal(k_state, (B, state_dim), jnp.float32)
    action = jax.random.normal(k_action, (B, action_dim), jnp.float32)

    r_logp, r_value, r_ent = _reference(state, action, params)

    # Exact-parity path: f32 weight slabs, tight tolerance.
    packed_f32 = pack_params(params, dtype=jnp.float32)
    logp, value, ent = actor_critic_continuous_evaluate(state, action, packed_f32)
    jax.block_until_ready((logp, value, ent))
    assert jnp.allclose(logp, r_logp, rtol=1e-4, atol=1e-4), "logprob mismatch"
    assert jnp.allclose(value, r_value, rtol=1e-4, atol=1e-4), "value mismatch"
    assert jnp.allclose(ent, r_ent, rtol=1e-4, atol=1e-4), "entropy mismatch"

    # Throughput path: bf16 weight slabs (full-rate MXU), reduced-precision
    # sanity check only.
    packed_bf16 = pack_params(params)  # default bfloat16
    logp_b, value_b, ent_b = actor_critic_continuous_evaluate(state, action, packed_bf16)
    jax.block_until_ready((logp_b, value_b, ent_b))
    assert jnp.allclose(logp_b, r_logp, rtol=0.1, atol=0.5), "bf16 logprob mismatch"
    assert jnp.allclose(value_b, r_value, rtol=0.1, atol=0.5), "bf16 value mismatch"
    assert jnp.allclose(ent_b, r_ent, rtol=0.1, atol=0.5), "bf16 entropy mismatch"

    # TODO(synk): act()'s Normal.sample() path (stochastic action draw) is not
    # implemented; only the deterministic evaluate() forward is kernelized.
    print("KERNEL_OK")
</pallas_src>

<mosaic_0001>
module attributes {stable_mosaic.version = 11 : i64} {
  func.func @_ppo_eval_kernel(%arg0: i32, %arg1: memref<16x128xf32, #tpu.memory_space<vmem>>, %arg2: memref<4x128xf32, #tpu.memory_space<vmem>>, %arg3: memref<64x16xf32, #tpu.memory_space<vmem>>, %arg4: memref<64x64xf32, #tpu.memory_space<vmem>>, %arg5: memref<16x64xf32, #tpu.memory_space<vmem>>, %arg6: memref<64x3xf32, #tpu.memory_space<vmem>>, %arg7: memref<3x128xf32, #tpu.memory_space<vmem>>) attributes {dimension_semantics = [#tpu.dimension_semantics<parallel>], iteration_bounds = array<i64: 1>, scalar_prefetch = 0 : i64, scratch_operands = 0 : i64, tpu.core_type = #tpu.core_type<tc>, window_params = [{transform_indices = @transform_0, window_bounds = array<i64: 16, 128>}, {transform_indices = @transform_1, window_bounds = array<i64: 4, 128>}, {pipeline_mode = #tpu.pipeline_mode<synchronous>, transform_indices = @transform_2, window_bounds = array<i64: 64, 16>}, {pipeline_mode = #tpu.pipeline_mode<synchronous>, transform_indices = @transform_3, window_bounds = array<i64: 64, 64>}, {pipeline_mode = #tpu.pipeline_mode<synchronous>, transform_indices = @transform_4, window_bounds = array<i64: 16, 64>}, {pipeline_mode = #tpu.pipeline_mode<synchronous>, transform_indices = @transform_5, window_bounds = array<i64: 64, 3>}, {transform_indices = @transform_6, window_bounds = array<i64: 3, 128>}]} {
    %c0 = arith.constant 0 : index
    %c0_0 = arith.constant 0 : index
    %0 = vector.load %arg1[%c0, %c0_0] : memref<16x128xf32, #tpu.memory_space<vmem>>, vector<16x128xf32>
    %c0_1 = arith.constant 0 : index
    %c0_2 = arith.constant 0 : index
    %1 = vector.load %arg2[%c0_1, %c0_2] : memref<4x128xf32, #tpu.memory_space<vmem>>, vector<4x128xf32>
    %c0_3 = arith.constant 0 : index
    %c0_4 = arith.constant 0 : index
    %2 = vector.load %arg6[%c0_3, %c0_4] : memref<64x3xf32, #tpu.memory_space<vmem>>, vector<64x3xf32>
    %3 = vector.extract_strided_slice %2 {offsets = [0, 0], sizes = [64, 1], strides = [1, 1]} : vector<64x3xf32> to vector<64x1xf32>
    %4 = vector.extract_strided_slice %2 {offsets = [0, 1], sizes = [64, 1], strides = [1, 1]} : vector<64x3xf32> to vector<64x1xf32>
    %5 = vector.extract_strided_slice %2 {offsets = [0, 2], sizes = [16, 1], strides = [1, 1]} : vector<64x3xf32> to vector<16x1xf32>
    %c0_5 = arith.constant 0 : index
    %c0_6 = arith.constant 0 : index
    %6 = vector.load %arg3[%c0_5, %c0_6] : memref<64x16xf32, #tpu.memory_space<vmem>>, vector<64x16xf32>
    %cst = arith.constant dense<0.000000e+00> : vector<64x128xf32>
    %7 = tpu.matmul %6, %0, %cst {dimension_numbers = #tpu.dot_dimension_numbers<[1], [0], [0], [1], [0, 0, 1, 1], [], []>} : vector<64x16xf32>, vector<16x128xf32>, vector<64x128xf32> -> vector<64x128xf32>
    %8 = vector.broadcast %3 : vector<64x1xf32> to vector<64x128xf32>
    %9 = arith.addf %7, %8 : vector<64x128xf32>
    %10 = math.tanh %9 : vector<64x128xf32>
    %c0_7 = arith.constant 0 : index
    %c0_8 = arith.constant 0 : index
    %11 = vector.load %arg4[%c0_7, %c0_8] : memref<64x64xf32, #tpu.memory_space<vmem>>, vector<64x64xf32>
    %cst_9 = arith.constant dense<0.000000e+00> : vector<64x128xf32>
    %12 = tpu.matmul %11, %10, %cst_9 {dimension_numbers = #tpu.dot_dimension_numbers<[1], [0], [0], [1], [0, 0, 1, 1], [], []>} : vector<64x64xf32>, vector<64x128xf32>, vector<64x128xf32> -> vector<64x128xf32>
    %13 = vector.broadcast %4 : vector<64x1xf32> to vector<64x128xf32>
    %14 = arith.addf %12, %13 : vector<64x128xf32>
    %15 = math.tanh %14 : vector<64x128xf32>
    %c0_10 = arith.constant 0 : index
    %c0_11 = arith.constant 0 : index
    %16 = vector.load %arg5[%c0_10, %c0_11] : memref<16x64xf32, #tpu.memory_space<vmem>>, vector<16x64xf32>
    %cst_12 = arith.constant dense<0.000000e+00> : vector<16x128xf32>
    %17 = tpu.matmul %16, %15, %cst_12 {dimension_numbers = #tpu.dot_dimension_numbers<[1], [0], [0], [1], [0, 0, 1, 1], [], []>} : vector<16x64xf32>, vector<64x128xf32>, vector<16x128xf32> -> vector<16x128xf32>
    %18 = vector.broadcast %5 : vector<16x1xf32> to vector<16x128xf32>
    %19 = arith.addf %17, %18 : vector<16x128xf32>
    %20 = vector.extract_strided_slice %19 {offsets = [0, 0], sizes = [4, 128], strides = [1, 1]} : vector<16x128xf32> to vector<4x128xf32>
    %21 = math.tanh %20 : vector<4x128xf32>
    %22 = vector.extract_strided_slice %19 {offsets = [4, 0], sizes = [4, 128], strides = [1, 1]} : vector<16x128xf32> to vector<4x128xf32>
    %23 = vector.extract_strided_slice %19 {offsets = [8, 0], sizes = [1, 128], strides = [1, 1]} : vector<16x128xf32> to vector<1x128xf32>
    %24 = arith.subf %1, %21 : vector<4x128xf32>
    %cst_13 = arith.constant -2.000000e+00 : f32
    %25 = vector.broadcast %cst_13 : f32 to vector<4x128xf32>
    %26 = arith.mulf %25, %22 : vector<4x128xf32>
    %27 = math.exp %26 : vector<4x128xf32>
    %cst_14 = arith.constant -5.000000e-01 : f32
    %28 = vector.broadcast %cst_14 : f32 to vector<4x128xf32>
    %29 = arith.mulf %28, %24 : vector<4x128xf32>
    %30 = arith.mulf %29, %24 : vector<4x128xf32>
    %31 = arith.mulf %30, %27 : vector<4x128xf32>
    %32 = arith.subf %31, %22 : vector<4x128xf32>
    %cst_15 = arith.constant 0.918938517 : f32
    %33 = vector.broadcast %cst_15 : f32 to vector<4x128xf32>
    %34 = arith.subf %32, %33 : vector<4x128xf32>
    %cst_16 = arith.constant dense<0.000000e+00> : vector<128xf32>
    %35 = vector.multi_reduction <add>, %34, %cst_16 [0] : vector<4x128xf32> to vector<128xf32>
    %36 = vector.shape_cast %35 : vector<128xf32> to vector<1x128xf32>
    %cst_17 = arith.constant dense<0.000000e+00> : vector<128xf32>
    %37 = vector.multi_reduction <add>, %22, %cst_17 [0] : vector<4x128xf32> to vector<128xf32>
    %38 = vector.shape_cast %37 : vector<128xf32> to vector<1x128xf32>
    %cst_18 = arith.constant 5.67575407 : f32
    %39 = vector.broadcast %cst_18 : f32 to vector<1x128xf32>
    %40 = arith.addf %38, %39 : vector<1x128xf32>
    %c0_19 = arith.constant 0 : index
    %c0_20 = arith.constant 0 : index
    %41 = vector.load %arg7[%c0_19, %c0_20] : memref<3x128xf32, #tpu.memory_space<vmem>>, vector<1x128xf32>
    tpu.vector_store %arg7[%c0_19, %c0_20], %36 {strides = array<i32>} : memref<3x128xf32, #tpu.memory_space<vmem>>, vector<1x128xf32>,
    %c1 = arith.constant 1 : index
    %c0_21 = arith.constant 0 : index
    %42 = vector.load %arg7[%c1, %c0_21] : memref<3x128xf32, #tpu.memory_space<vmem>>, vector<1x128xf32>
    tpu.vector_store %arg7[%c1, %c0_21], %23 {strides = array<i32>} : memref<3x128xf32, #tpu.memory_space<vmem>>, vector<1x128xf32>,
    %c2 = arith.constant 2 : index
    %c0_22 = arith.constant 0 : index
    %43 = vector.load %arg7[%c2, %c0_22] : memref<3x128xf32, #tpu.memory_space<vmem>>, vector<1x128xf32>
    tpu.vector_store %arg7[%c2, %c0_22], %40 {strides = array<i32>} : memref<3x128xf32, #tpu.memory_space<vmem>>, vector<1x128xf32>,
    return
  }
  func.func @transform_0(%arg0: i32) -> (i32, i32) {
    %c0_i32 = arith.constant 0 : i32
    %c0_i32_0 = arith.constant 0 : i32
    return %c0_i32, %arg0 : i32, i32
  }
  func.func @transform_1(%arg0: i32) -> (i32, i32) {
    %c0_i32 = arith.constant 0 : i32
    %c0_i32_0 = arith.constant 0 : i32
    return %c0_i32, %arg0 : i32, i32
  }
  func.func @transform_2(%arg0: i32) -> (i32, i32) {
    %c0_i32 = arith.constant 0 : i32
    %c0_i32_0 = arith.constant 0 : i32
    %c0_i32_1 = arith.constant 0 : i32
    return %c0_i32, %c0_i32_0 : i32, i32
  }
  func.func @transform_3(%arg0: i32) -> (i32, i32) {
    %c0_i32 = arith.constant 0 : i32
    %c0_i32_0 = arith.constant 0 : i32
    %c0_i32_1 = arith.constant 0 : i32
    return %c0_i32, %c0_i32_0 : i32, i32
  }
  func.func @transform_4(%arg0: i32) -> (i32, i32) {
    %c0_i32 = arith.constant 0 : i32
    %c0_i32_0 = arith.constant 0 : i32
    %c0_i32_1 = arith.constant 0 : i32
    return %c0_i32, %c0_i32_0 : i32, i32
  }
  func.func @transform_5(%arg0: i32) -> (i32, i32) {
    %c0_i32 = arith.constant 0 : i32
    %c0_i32_0 = arith.constant 0 : i32
    %c0_i32_1 = arith.constant 0 : i32
    return %c0_i32, %c0_i32_0 : i32, i32
  }
  func.func @transform_6(%arg0: i32) -> (i32, i32) {
    %c0_i32 = arith.constant 0 : i32
    %c0_i32_0 = arith.constant 0 : i32
    return %c0_i32, %arg0 : i32, i32
  }
}

</mosaic_0001>

<bundles_post_ra>
// kernel: tpu_custom_call.1
= control target key start
LH: loop header
LB: loop body
LE: loop exit
PB: predicated region body
PF: predicated region fallthrough
CT: control target
= control target key end

     0   :  { %vm83_vm0 = vcmask 130048   ;;  %v725_v4 = vmov 0   ;;  %s884_s0 = inlined_call_operand.vmem [shape: f32[16,128], index: 0, kind: input, shape index: {}]   ;;  %s885_s1 = inlined_call_operand.vmem [shape: f32[4,128], index: 1, kind: input, shape index: {}]   ;;  %s886_s2 = inlined_call_operand.vmem [shape: f32[64,16], index: 2, kind: input, shape index: {}]   ;;  %s887_s3 = inlined_call_operand.vmem [shape: f32[64,64], index: 3, kind: input, shape index: {}]   ;;  %s888_s4 = inlined_call_operand.vmem [shape: f32[16,64], index: 4, kind: input, shape index: {}]   ;;  %s889_s5 = inlined_call_operand.vmem [shape: f32[64,3], index: 5, kind: input, shape index: {}]   ;;  %s890_s6 = inlined_call_operand.hbm [shape: f32[3,128], index: 6, kind: output, shape index: {}]  }
   0x1   :  { %v25_v0 = vld [vmem:[%s884_s0 + $0x8] sm:$0xff]  ;;  %v24_v1 = vld [vmem:[%s884_s0] sm:$0xff]  ;;  %661 = vset.pattern.permute.xlu0 %v725_v4  ;;  %v37_v5 = vld [vmem:[%s886_s2 + $0x10] sm:$0xff]  ;;  %662 = vset.pattern.permute.xlu1 %v725_v4 }
   0x2   :  { %v35_v2 = vld [vmem:[%s886_s2] sm:$0xff]  ;;  %594 = vmatprep.subr.mxu0 %v25_v0  ;;  %v36_v3 = vld [vmem:[%s886_s2 + $0x8] sm:$0xff]  ;;  %v34_v6 = vld [vmem:[%s889_s5 + $0x38] sm:$0xff] }
   0x3   :  { %598 = vmatprep.mubr.msk.f32.mxu0 %vm83_vm0, %v35_v2  ;;  %595 = vmatpush3.msra.mxu0 %v25_v0  ;;  %v32_v7 = vld [vmem:[%s889_s5 + $0x28] sm:$0xff]  ;;  %v33_v8 = vld [vmem:[%s889_s5 + $0x30] sm:$0xff]  ;;  %v38_v9 = vld [vmem:[%s886_s2 + $0x18] sm:$0xff] }
   0x4   :  { %596 = vmatprep.subr.mxu0 %v24_v1  ;;  %80 = vperm.xlu0 %661, %v34_v6   ;;  %v31_v10 = vld [vmem:[%s889_s5 + $0x20] sm:$0xff] }
   0x5   :  { %597 = vmatpush3.msra.mxu0 %v24_v1  ;;  %70 = vperm.xlu1 %662, %v32_v7  }
   0x6   :  { %599 = vmatmul.mubr.msk.f32.vlgmr.msra.gmra.mxu0 %vm83_vm0, %v36_v3 }
   0x7   :  { %601 = vmatprep.mubr.msk.f32.mxu0 %vm83_vm0, %v37_v5 }
   0x8   :  { %11 = vsyncpa [#allocation3], 0  ;;  %v39_v11 = vld [vmem:[%s886_s2 + $0x20] sm:$0xff]  ;;  %75 = vperm.xlu0 %661, %v33_v8   ;;  %v30_v12 = vld [vmem:[%s889_s5 + $0x18] sm:$0xff]  ;;  %vm261_vm1 = vcmask 523264   ;;  %v726_v20 = vmov 1  }
   0x9   :  { %65 = vperm.xlu1 %662, %v31_v10   ;;  %v40_v13 = vld [vmem:[%s886_s2 + $0x28] sm:$0xff]  ;;  %v29_v14 = vld [vmem:[%s889_s5 + $0x10] sm:$0xff]  ;;  %v42_v17 = vld [vmem:[%s886_s2 + $0x38] sm:$0xff]  ;;  %v727_v61 = vmov 2   ;;  %vm506_vm2 = vcmask 1043456  }
   0xa   :  { %602 = vmatmul.mubr.msk.f32.gmra.mxu0 %vm83_vm0, %v38_v9  ;;  %v41_v15 = vld [vmem:[%s886_s2 + $0x30] sm:$0xff]  ;;  %v818_v16 = vld [vmem:[%s889_s5 + $0x8] sm:$0xff]  ;;  %v827_v18 = vld [vmem:[%s889_s5] sm:$0xff] }
   0xb   :  { %604 = vmatprep.mubr.msk.f32.mxu0 %vm83_vm0, %v39_v11  ;;  %v221_v19 = vld [vmem:[%s887_s3] sm:$0xff]  ;;  %v222_v53 = vld [vmem:[%s887_s3 + $0x8] sm:$0xff]  ;;  %v223_v54 = vld [vmem:[%s887_s3 + $0x10] sm:$0xff] }
   0xc   :  { %60 = vperm.xlu0 %661, %v30_v12   ;;  %626 = vmatprep.mubr.msk.f32.mxu1 %vm261_vm1, %v221_v19  ;;  %v224_v55 = vld [vmem:[%s887_s3 + $0x18] sm:$0xff]  ;;  %v225_v56 = vld [vmem:[%s887_s3 + $0x20] sm:$0xff]  ;;  %v226_v57 = vld [vmem:[%s887_s3 + $0x28] sm:$0xff] }
   0xd   :  { %55 = vperm.xlu1 %662, %v29_v14   ;;  %v227_v58 = vld [vmem:[%s887_s3 + $0x30] sm:$0xff]  ;;  %v228_v59 = vld [vmem:[%s887_s3 + $0x38] sm:$0xff]  ;;  %v399_v60 = vld [vmem:[%s888_s4] sm:$0xff] }
   0xe   :  { %605 = vmatmul.mubr.msk.f32.gmra.mxu0 %vm83_vm0, %v40_v13 }
   0xf   :  { %607 = vmatprep.mubr.msk.f32.mxu0 %vm83_vm0, %v41_v15 }
  0x10   :  { %50 = vperm.xlu0 %661, %v818_v16  }
  0x11   :  { %45 = vperm.xlu1 %662, %v827_v18  }
  0x12   :  { %608 = vmatmul.mubr.msk.f32.gmra.mxu0 %vm83_vm0, %v42_v17 }
  0x13   :  { %654 = vmatprep.mubr.msk.f32.mxu0 %vm261_vm1, %v399_v60 }
  0x14   :  { %663 = vset.pattern.permute.xlu0 %v726_v20 }
  0x15   :  { %664 = vset.pattern.permute.xlu1 %v726_v20  ;;  %258 = vperm.xlu0 %663, %v34_v6  }
  0x16   :  { %254 = vperm.xlu1 %664, %v33_v8  }
  0x19   :  { %246 = vperm.xlu0 %663, %v31_v10  }
  0x1a   :  { %250 = vperm.xlu1 %664, %v32_v7  }
  0x1d   :  { %238 = vperm.xlu0 %663, %v29_v14  }
  0x1e   :  { %242 = vperm.xlu1 %664, %v30_v12  }
  0x21   :  { %230 = vperm.xlu0 %663, %v827_v18  }
  0x22   :  { %234 = vperm.xlu1 %664, %v818_v16  }
  0x25   :  { %666 = vset.pattern.permute.xlu0 %v727_v61 }
  0x26   :  { %665 = vset.pattern.permute.xlu1 %v727_v61  ;;  %406 = vperm.xlu0 %666, %v818_v16  }
  0x27   :  { %402 = vperm.xlu1 %665, %v827_v18  }
  0x7f   :  { %v81_v22 = vpop.permute.xlu0 %80 }
  0x80   :  { %v71_v24 = vpop.permute.xlu1 %70 }
  0x83   :  { %v76_v27 = vpop.permute.xlu0 %75 }
  0x84   :  { %v66_v29 = vpop.permute.xlu1 %65 }
  0x87   :  { %v61_v33 = vpop.permute.xlu0 %60 }
  0x88   :  { %v56_v37 = vpop.permute.xlu1 %55 }
  0x8b   :  { %v51_v40 = vpop.permute.xlu0 %50 }
  0x8c   :  { %v46_v42 = vpop.permute.xlu1 %45 }
  0x90   :  { %v259_v1 = vpop.permute.xlu0 %258 }
  0x91   :  { %v255_v63 = vpop.permute.xlu1 %254 }
  0x94   :  { %v247_v6 = vpop.permute.xlu0 %246 }
  0x95   :  { %v251_v4 = vpop.permute.xlu1 %250 }
  0x98   :  { %v239_v14 = vpop.permute.xlu0 %238 }
  0x99   :  { %v243_v10 = vpop.permute.xlu1 %242 }
  0x9c   :  { %v231_v19 = vpop.permute.xlu0 %230 }
  0x9d   :  { %v235_v17 = vpop.permute.xlu1 %234 }
  0xc6   :  { %v600_v21 = vpop.f32.mrf.mxu0 }
  0xc7   :  { %v180_v43 = vadd.f32 %v600_v21, %v51_v40 }
  0xc8   :  { %v174_v23 = vpop.f32.mrf.mxu0 }
  0xc9   :  { %v175_v44 = vadd.f32 %v174_v23, %v46_v42 }
  0xca   :  { %v603_v25 = vpop.f32.mrf.mxu0 }
  0xcb   :  { %v190_v39 = vadd.f32 %v603_v25, %v61_v33  ;;  %v403_v33 = vpop.permute.xlu1 %402 }
  0xcc   :  { %v184_v26 = vpop.f32.mrf.mxu0 }
  0xcd   :  { %v185_v41 = vadd.f32 %v184_v26, %v56_v37 }
  0xce   :  { %v606_v28 = vpop.f32.mrf.mxu0 }
  0xcf   :  { %v200_v35 = vadd.f32 %v606_v28, %v71_v24 }
  0xd0   :  { %v194_v30 = vpop.f32.mrf.mxu0 }
  0xd1   :  { %v195_v38 = vadd.f32 %v194_v30, %v66_v29  ;;  %v400_v30 = vld [vmem:[%s888_s4 + $0x8] sm:$0xff] }
  0xd2   :  { %v609_v31 = vpop.f32.mrf.mxu0 }
  0xd3   :  { %v210_v32 = vadd.f32 %v609_v31, %v81_v22  ;;  %v407_v31 = vpop.permute.xlu0 %406 }
  0xd4   :  { %v204_v34 = vpop.f32.mrf.mxu0 }
  0xd5   :  { %667 = vtanh.f32 %v210_v32  ;;  %v205_v36 = vadd.f32 %v204_v34, %v76_v27 }
  0xd7   :  { %669 = vtanh.f32 %v205_v36 }
  0xd8   :  { %671 = vtanh.f32 %v200_v35 }
  0xd9   :  { %673 = vtanh.f32 %v195_v38 }
  0xda   :  { %675 = vtanh.f32 %v190_v39 }
  0xdb   :  { %677 = vtanh.f32 %v185_v41 }
  0xdc   :  { %679 = vtanh.f32 %v180_v43 }
  0xdd   :  { %681 = vtanh.f32 %v175_v44 }
  0xe2   :  { %v668_v45 = vpop.eup %667 }
  0xe3   :  { %610 = vmatprep.subr.mxu1 %v668_v45 }
  0xe4   :  { %v670_v46 = vpop.eup %669  ;;  %611 = vmatpush3.msra.mxu1 %v668_v45  ;;  %v26_v45 = vld [vmem:[%s885_s1] sm:$0xf]  ;;  %s728_s1 = smov [#allocation2]  }
  0xe5   :  { %612 = vmatprep.subr.mxu1 %v670_v46  ;;  %v672_v47 = vpop.eup %671  ;;  %s531_s25 = sshll.u32 %s728_s1, 4  ;;  %s532_s25 = int_to_ptr.vmem [resolvable:$true] %s531_s25 }
  0xe6   :  { %613 = vmatpush3.msra.mxu1 %v670_v46  ;;  %v674_v48 = vpop.eup %673  ;;  %s703_s26 = scalar_lea.vmem %s532_s25, 64  ;;  %p708_p1 = scmp.lt.s32.totalorder %s532_s25, %s532_s25 }
  0xe7   :  { %614 = vmatprep.subr.mxu1 %v672_v47  ;;  %v676_v49 = vpop.eup %675  ;;  %p704_p0 = scmp.ne.s32.totalorder %s532_s25, %s703_s26  ;;  %p709_p2 = scmp.lt.s32.totalorder %s703_s26, %s703_s26 }
  0xe8   :  { %615 = vmatpush3.msra.mxu1 %v672_v47  ;;  %v678_v50 = vpop.eup %677 }
  0xe9   :  { %616 = vmatprep.subr.mxu1 %v674_v48  ;;  %v680_v51 = vpop.eup %679  ;;  %p710_p3 = por %p709_p2, %p708_p1 }
  0xea   :  { %617 = vmatpush3.msra.mxu1 %v674_v48  ;;  %v682_v52 = vpop.eup %681 }
  0xeb   :  { %618 = vmatprep.subr.mxu1 %v676_v49  ;;  %p711_p4 = pnand %p710_p3, %p704_p0 }
  0xec   :  { %619 = vmatpush3.msra.mxu1 %v676_v49 }
  0xed   :  { %620 = vmatprep.subr.mxu1 %v678_v50 }
  0xee   :  { %621 = vmatpush3.msra.mxu1 %v678_v50 }
  0xef   :  { %622 = vmatprep.subr.mxu1 %v680_v51 }
  0xf0   :  { %623 = vmatpush3.msra.mxu1 %v680_v51 }
  0xf1   :  { %624 = vmatprep.subr.mxu1 %v682_v52 }
  0xf2   :  { %625 = vmatpush3.msra.mxu1 %v682_v52 }
  0xf3   :  { %627 = vmatmul.mubr.msk.f32.vlgmr.msra.gmra.mxu1 %vm261_vm1, %v222_v53 }
  0xf4   :  { %629 = vmatprep.mubr.msk.f32.mxu1 %vm261_vm1, %v223_v54 }
  0xf7   :  { %630 = vmatmul.mubr.msk.f32.gmra.mxu1 %vm261_vm1, %v224_v55 }
  0xf8   :  { %632 = vmatprep.mubr.msk.f32.mxu1 %vm261_vm1, %v225_v56 }
  0xfb   :  { %633 = vmatmul.mubr.msk.f32.gmra.mxu1 %vm261_vm1, %v226_v57 }
  0xfc   :  { %635 = vmatprep.mubr.msk.f32.mxu1 %vm261_vm1, %v227_v58 }
  0xff   :  { %636 = vmatmul.mubr.msk.f32.gmra.mxu1 %vm261_vm1, %v228_v59 }
 0x1b3   :  { %v628_v62 = vpop.f32.mrf.mxu1 }
 0x1b4   :  { %v358_v20 = vadd.f32 %v628_v62, %v235_v17 }
 0x1b5   :  { %v352_v0 = vpop.f32.mrf.mxu1 }
 0x1b6   :  { %v353_v21 = vadd.f32 %v352_v0, %v231_v19 }
 0x1b7   :  { %v631_v2 = vpop.f32.mrf.mxu1 }
 0x1b8   :  { %v368_v16 = vadd.f32 %v631_v2, %v243_v10 }
 0x1b9   :  { %v362_v3 = vpop.f32.mrf.mxu1 }
 0x1ba   :  { %v363_v18 = vadd.f32 %v362_v3, %v239_v14 }
 0x1bb   :  { %v634_v5 = vpop.f32.mrf.mxu1 }
 0x1bc   :  { %v378_v12 = vadd.f32 %v634_v5, %v251_v4 }
 0x1bd   :  { %v372_v7 = vpop.f32.mrf.mxu1 }
 0x1be   :  { %v373_v15 = vadd.f32 %v372_v7, %v247_v6 }
 0x1bf   :  { %v637_v8 = vpop.f32.mrf.mxu1 }
 0x1c0   :  { %v388_v9 = vadd.f32 %v637_v8, %v259_v1 }
 0x1c1   :  { %v382_v11 = vpop.f32.mrf.mxu1 }
 0x1c2   :  { %683 = vtanh.f32 %v388_v9  ;;  %v383_v13 = vadd.f32 %v382_v11, %v255_v63 }
 0x1c4   :  { %685 = vtanh.f32 %v383_v13 }
 0x1c5   :  { %687 = vtanh.f32 %v378_v12 }
 0x1c6   :  { %689 = vtanh.f32 %v373_v15 }
 0x1c7   :  { %691 = vtanh.f32 %v368_v16 }
 0x1c8   :  { %693 = vtanh.f32 %v363_v18 }
 0x1c9   :  { %695 = vtanh.f32 %v358_v20 }
 0x1ca   :  { %697 = vtanh.f32 %v353_v21 }
 0x1cf   :  { %v684_v22 = vpop.eup %683 }
 0x1d0   :  { %638 = vmatprep.subr.mxu0 %v684_v22 }
 0x1d1   :  { %v686_v23 = vpop.eup %685  ;;  %639 = vmatpush3.msra.mxu0 %v684_v22 }
 0x1d2   :  { %640 = vmatprep.subr.mxu0 %v686_v23  ;;  %v688_v24 = vpop.eup %687 }
 0x1d3   :  { %641 = vmatpush3.msra.mxu0 %v686_v23  ;;  %v690_v25 = vpop.eup %689 }
 0x1d4   :  { %642 = vmatprep.subr.mxu0 %v688_v24  ;;  %v692_v26 = vpop.eup %691 }
 0x1d5   :  { %643 = vmatpush3.msra.mxu0 %v688_v24  ;;  %v694_v27 = vpop.eup %693 }
 0x1d6   :  { %644 = vmatprep.subr.mxu0 %v690_v25  ;;  %v696_v28 = vpop.eup %695 }
 0x1d7   :  { %645 = vmatpush3.msra.mxu0 %v690_v25  ;;  %v698_v29 = vpop.eup %697 }
 0x1d8   :  { %646 = vmatprep.subr.mxu0 %v692_v26 }
 0x1d9   :  { %647 = vmatpush3.msra.mxu0 %v692_v26 }
 0x1da   :  { %648 = vmatprep.subr.mxu0 %v694_v27 }
 0x1db   :  { %649 = vmatpush3.msra.mxu0 %v694_v27 }
 0x1dc   :  { %650 = vmatprep.subr.mxu0 %v696_v28 }
 0x1dd   :  { %651 = vmatpush3.msra.mxu0 %v696_v28 }
 0x1de   :  { %652 = vmatprep.subr.mxu0 %v698_v29 }
 0x1df   :  { %653 = vmatpush3.msra.mxu0 %v698_v29 }
 0x1e0   :  { %655 = vmatmul.mubr.msk.f32.vlgmr.msra.gmra.mxu0 %vm261_vm1, %v400_v30 }
 0x2a0   :  { %v656_v32 = vpop.f32.mrf.mxu0 }
 0x2a1   :  { %v487_v34 = vadd.f32 %v656_v32, %v407_v31 }
 0x2a2   :  { %v481_v35 = vpop.f32.mrf.mxu0 }
 0x2a3   :  { %523 = vst [vmem:[#allocation2 + $0x1] sm:$0x1] %v487_v34  ;;  %v482_v36 = vadd.f32 %v481_v35, %v403_v33 }
 0x2a5   :  { %699 = vtanh.f32 %v482_v36  ;;  %v492_v37 = vmul.f32 -2.0, %v482_v36  ;;  %v502_v38 = vrot.slane %v482_v36, 4 }
 0x2a7   :  { %v493_v39 = vmul.f32 1.442695, %v492_v37  ;;  %v514_v40 = vsel %vm506_vm2, %v502_v38, 0.0 }
 0x2a8   :  { %v515_v41 = vrot.slane %v514_v40, 4 }
 0x2a9   :  { %701 = vpow2.f32 %v493_v39 }
 0x2aa   :  { %v516_v42 = vadd.f32 %v515_v41, %v514_v40 }
 0x2ac   :  { %v517_v43 = vrot.slane %v516_v42, 2 }
 0x2ae   :  { %v518_v44 = vadd.f32 %v517_v43, %v516_v42 }
 0x2b0   :  { %v519_v46 = vrot.slane %v518_v44, 1 }
 0x2b2   :  { %v700_v47 = vpop.eup %699  ;;  %v520_v48 = vadd.f32 %v519_v46, %v518_v44 }
 0x2b3   :  { %v491_v49 = vsub.f32 %v26_v45, %v700_v47 }
 0x2b4   :  { %v521_v50 = vadd.f32 5.675754, %v520_v48 }
 0x2b5   :  { %v495_v51 = vmul.f32 -0.5, %v491_v49 }
 0x2b6   :  { %v702_v52 = vpop.eup %701  ;;  %524 = vst [vmem:[#allocation2 + $0x2] sm:$0x1] %v521_v50 }
 0x2b7   :  { %v496_v53 = vmul.f32 %v495_v51, %v491_v49  ;;  %v498_v54 = vrot.slane %v702_v52, 4 }
 0x2b9   :  { %v500_v55 = vmul.f32 %v498_v54, %v496_v53 }
 0x2bb   :  { %v504_v56 = vsub.f32 %v500_v55, %v502_v38 }
 0x2bd   :  { %v557_v57 = vadd.f32 -0.9189385, %v504_v56 }
 0x2bf   :  { %v507_v58 = vsel %vm506_vm2, %v557_v57, 0.0 }
 0x2c0   :  { %v508_v59 = vrot.slane %v507_v58, 4 }
 0x2c2   :  { %v509_v60 = vadd.f32 %v508_v59, %v507_v58 }
 0x2c4   :  { %v510_v61 = vrot.slane %v509_v60, 2 }
 0x2c6   :  { %v511_v62 = vadd.f32 %v510_v61, %v509_v60 }
 0x2c8   :  { %v512_v63 = vrot.slane %v511_v62, 1 }
 0x2ca   :  { %v513_v0 = vadd.f32 %v512_v63, %v511_v62 }
 0x2cc   :  { %522 = vst [vmem:[#allocation2] sm:$0x1] %v513_v0 }
 0x2cd   :  { %714 = shalt.err (!%p711_p4)
}
 0x2ce   :  { %534 = dma.vmem_to_hbm [thread:$0]  %s532_s25, 64, %s890_s6, [#allocation3]  }
 0x2cf   :  { %723 = dma.done.wait [#allocation3], 64  }
 0x2d0   :  { %724 = vsyncadd [#allocation3], 4294967232 }
 0x2d1   :  { %538 = vsyncpa [#allocation3], 1 }

</bundles_post_ra>
